<compile_context>
chip_gen: v5e
topology: v5e:2x2
jax: 0.10.0
libtpu: 0.0.40
codegen_flags: <defaults>
</compile_context>

<pallas_src>
import numpy as np
import jax
import jax.numpy as jnp
from jax.experimental import pallas as pl
from jax.experimental.pallas import tpu as pltpu

# Model hyper-parameters (GPRGNN defaults: K=10, alpha=0.1, Init='PPR')
K = 10
ALPHA = 0.1

# Problem sizes (small, TPU-friendly)
N_NODES = 128
IN_CH = 32
HID_CH = 64
OUT_CH = 16


def gprgnn_kernel(xT_ref, w1_ref, b1_ref, w2_ref, b2_ref, adj_ref, temp_ref, outT_ref):
    # --- MLP part (feature-major): lin1 -> relu -> lin2 (dropout is identity in eval) ---
    # hT = relu(W1 @ xT + b1) : (HID_CH, N), N on the lane axis.
    hT = jnp.dot(w1_ref[...], xT_ref[...], preferred_element_type=jnp.float32) + b1_ref[...]
    hT = jnp.maximum(hT, 0.0)
    # yT = W2 @ hT + b2 : (OUT_CH, N)
    yT = jnp.dot(w2_ref[...], hT, preferred_element_type=jnp.float32) + b2_ref[...]

    # --- GPR_prop: hiddenT = sum_k temp[k] * yT @ A_hat^k  (A_hat symmetric) ---
    adj = adj_ref[...]  # loop-invariant MXU RHS, held across all K steps
    hiddenT = yT * temp_ref[0]
    for k in range(K):  # K is static -> unrolled serial chain
        yT = jnp.dot(yT, adj, preferred_element_type=jnp.float32)
        hiddenT = hiddenT + temp_ref[k + 1] * yT
    outT_ref[...] = hiddenT
    # TODO(synk): could drive the MXU explicitly (pltpu.matmul_push_rhs /
    # matmul_acc_lhs / matmul_pop) to pin adj in the weight registers across the
    # 10-step chain; the loop-invariant-RHS jnp.dot formulation already exposes this.


def gprgnn_forward(x, w1, b1, w2, b2, adj_hat, temp):
    """x:(N,IN)  w1:(HID,IN)  b1:(HID,)  w2:(OUT,HID)  b2:(OUT,)  adj_hat:(N,N)  temp:(K+1,)"""
    n = x.shape[0]
    out_ch = w2.shape[0]
    vmem = pl.BlockSpec(memory_space=pltpu.MemorySpace.VMEM)
    smem = pl.BlockSpec(memory_space=pltpu.MemorySpace.SMEM)

    xT = x.T                        # (IN_CH, N)  -> N on lanes
    b1c = b1.reshape(-1, 1)         # (HID_CH, 1) column bias (broadcast over lanes)
    b2c = b2.reshape(-1, 1)         # (OUT_CH, 1)

    outT = pl.pallas_call(
        gprgnn_kernel,
        out_shape=jax.ShapeDtypeStruct((out_ch, n), jnp.float32),
        in_specs=[vmem, vmem, vmem, vmem, vmem, vmem, smem],
        out_specs=vmem,
    )(xT, w1, b1c, w2, b2c, adj_hat, temp)
    return outT.T                   # back to (N, OUT_CH)


def build_params(key):
    k1, k2, k3, k4 = jax.random.split(key, 4)
    # nn.Linear default init: U(-1/sqrt(fan_in), 1/sqrt(fan_in)) for weight & bias
    lim1 = 1.0 / np.sqrt(IN_CH)
    lim2 = 1.0 / np.sqrt(HID_CH)
    w1 = jax.random.uniform(k1, (HID_CH, IN_CH), jnp.float32, -lim1, lim1)
    b1 = jax.random.uniform(k2, (HID_CH,), jnp.float32, -lim1, lim1)
    w2 = jax.random.uniform(k3, (OUT_CH, HID_CH), jnp.float32, -lim2, lim2)
    b2 = jax.random.uniform(k4, (OUT_CH,), jnp.float32, -lim2, lim2)
    # PPR init of GPR gamma coefficients (1-D -> cheap un-padded SMEM layout)
    temp = ALPHA * (1.0 - ALPHA) ** np.arange(K + 1)
    temp[-1] = (1.0 - ALPHA) ** K
    temp = jnp.asarray(temp, jnp.float32)
    return w1, b1, w2, b2, temp


def build_graph(key, n):
    # Random undirected graph -> gcn_norm dense matrix D^{-1/2}(A+I)D^{-1/2}.
    a = (jax.random.uniform(key, (n, n)) < 0.05).astype(jnp.float32)
    a = jnp.maximum(a, a.T)                      # symmetric (undirected)
    a = a * (1.0 - jnp.eye(n)) + jnp.eye(n)      # add self loops (fill_value=1)
    deg = jnp.sum(a, axis=1)
    dinv = 1.0 / jnp.sqrt(deg)
    adj_hat = dinv[:, None] * a * dinv[None, :]
    return adj_hat.astype(jnp.float32)


def reference_forward(x, w1, b1, w2, b2, adj_hat, temp):
    h = jnp.maximum(x @ w1.T + b1[None, :], 0.0)
    y = h @ w2.T + b2[None, :]
    hidden = temp[0] * y
    for k in range(K):
        y = adj_hat @ y
        hidden = hidden + temp[k + 1] * y
    return hidden


if __name__ == "__main__":
    key = jax.random.PRNGKey(0)
    kx, kg, kp = jax.random.split(key, 3)

    x = jax.random.normal(kx, (N_NODES, IN_CH), jnp.float32)
    adj_hat = build_graph(kg, N_NODES)
    w1, b1, w2, b2, temp = build_params(kp)

    # TODO(synk): dropout (p=0.5) / dprate dropout are training-only; eval mode => identity.

    out = gprgnn_forward(x, w1, b1, w2, b2, adj_hat, temp)
    out = jax.block_until_ready(out)

    ref = reference_forward(x, w1, b1, w2, b2, adj_hat, temp)
    np.testing.assert_allclose(np.asarray(out), np.asarray(ref), rtol=1e-4, atol=1e-4)

    print("KERNEL_OK")
</pallas_src>

<mosaic_0001>
module attributes {stable_mosaic.version = 11 : i64} {
  func.func @gprgnn_kernel(%arg0: memref<32x128xf32, #tpu.memory_space<vmem>>, %arg1: memref<64x32xf32, #tpu.memory_space<vmem>>, %arg2: memref<64x1xf32, #tpu.memory_space<vmem>>, %arg3: memref<16x64xf32, #tpu.memory_space<vmem>>, %arg4: memref<16x1xf32, #tpu.memory_space<vmem>>, %arg5: memref<128x128xf32, #tpu.memory_space<vmem>>, %arg6: memref<11xf32, #tpu.memory_space<smem>>, %arg7: memref<16x128xf32, #tpu.memory_space<vmem>>) attributes {dimension_semantics = [], scalar_prefetch = 0 : i64, scratch_operands = 0 : i64, tpu.core_type = #tpu.core_type<tc>} {
    %c0 = arith.constant 0 : index
    %c0_0 = arith.constant 0 : index
    %0 = vector.load %arg1[%c0, %c0_0] : memref<64x32xf32, #tpu.memory_space<vmem>>, vector<64x32xf32>
    %c0_1 = arith.constant 0 : index
    %c0_2 = arith.constant 0 : index
    %1 = vector.load %arg0[%c0_1, %c0_2] : memref<32x128xf32, #tpu.memory_space<vmem>>, vector<32x128xf32>
    %cst = arith.constant dense<0.000000e+00> : vector<64x128xf32>
    %2 = tpu.matmul %0, %1, %cst {dimension_numbers = #tpu.dot_dimension_numbers<[1], [0], [0], [1], [0, 0, 1, 1], [], []>} : vector<64x32xf32>, vector<32x128xf32>, vector<64x128xf32> -> vector<64x128xf32>
    %c0_3 = arith.constant 0 : index
    %c0_4 = arith.constant 0 : index
    %3 = vector.load %arg2[%c0_3, %c0_4] : memref<64x1xf32, #tpu.memory_space<vmem>>, vector<64x1xf32>
    %4 = vector.broadcast %3 : vector<64x1xf32> to vector<64x128xf32>
    %5 = arith.addf %2, %4 : vector<64x128xf32>
    %cst_5 = arith.constant 0.000000e+00 : f32
    %6 = vector.broadcast %cst_5 : f32 to vector<64x128xf32>
    %7 = arith.maximumf %5, %6 : vector<64x128xf32>
    %c0_6 = arith.constant 0 : index
    %c0_7 = arith.constant 0 : index
    %8 = vector.load %arg3[%c0_6, %c0_7] : memref<16x64xf32, #tpu.memory_space<vmem>>, vector<16x64xf32>
    %cst_8 = arith.constant dense<0.000000e+00> : vector<16x128xf32>
    %9 = tpu.matmul %8, %7, %cst_8 {dimension_numbers = #tpu.dot_dimension_numbers<[1], [0], [0], [1], [0, 0, 1, 1], [], []>} : vector<16x64xf32>, vector<64x128xf32>, vector<16x128xf32> -> vector<16x128xf32>
    %c0_9 = arith.constant 0 : index
    %c0_10 = arith.constant 0 : index
    %10 = vector.load %arg4[%c0_9, %c0_10] : memref<16x1xf32, #tpu.memory_space<vmem>>, vector<16x1xf32>
    %11 = vector.broadcast %10 : vector<16x1xf32> to vector<16x128xf32>
    %12 = arith.addf %9, %11 : vector<16x128xf32>
    %c0_11 = arith.constant 0 : index
    %c0_12 = arith.constant 0 : index
    %13 = vector.load %arg5[%c0_11, %c0_12] : memref<128x128xf32, #tpu.memory_space<vmem>>, vector<128x128xf32>
    %c0_13 = arith.constant 0 : index
    %14 = memref.load %arg6[%c0_13] : memref<11xf32, #tpu.memory_space<smem>>
    %15 = vector.broadcast %14 : f32 to vector<16x128xf32>
    %16 = arith.mulf %12, %15 : vector<16x128xf32>
    %cst_14 = arith.constant dense<0.000000e+00> : vector<16x128xf32>
    %17 = tpu.matmul %12, %13, %cst_14 {dimension_numbers = #tpu.dot_dimension_numbers<[1], [0], [0], [1], [0, 0, 1, 1], [], []>} : vector<16x128xf32>, vector<128x128xf32>, vector<16x128xf32> -> vector<16x128xf32>
    %c1 = arith.constant 1 : index
    %18 = memref.load %arg6[%c1] : memref<11xf32, #tpu.memory_space<smem>>
    %19 = vector.broadcast %18 : f32 to vector<16x128xf32>
    %20 = arith.mulf %19, %17 : vector<16x128xf32>
    %21 = arith.addf %16, %20 : vector<16x128xf32>
    %cst_15 = arith.constant dense<0.000000e+00> : vector<16x128xf32>
    %22 = tpu.matmul %17, %13, %cst_15 {dimension_numbers = #tpu.dot_dimension_numbers<[1], [0], [0], [1], [0, 0, 1, 1], [], []>} : vector<16x128xf32>, vector<128x128xf32>, vector<16x128xf32> -> vector<16x128xf32>
    %c2 = arith.constant 2 : index
    %23 = memref.load %arg6[%c2] : memref<11xf32, #tpu.memory_space<smem>>
    %24 = vector.broadcast %23 : f32 to vector<16x128xf32>
    %25 = arith.mulf %24, %22 : vector<16x128xf32>
    %26 = arith.addf %21, %25 : vector<16x128xf32>
    %cst_16 = arith.constant dense<0.000000e+00> : vector<16x128xf32>
    %27 = tpu.matmul %22, %13, %cst_16 {dimension_numbers = #tpu.dot_dimension_numbers<[1], [0], [0], [1], [0, 0, 1, 1], [], []>} : vector<16x128xf32>, vector<128x128xf32>, vector<16x128xf32> -> vector<16x128xf32>
    %c3 = arith.constant 3 : index
    %28 = memref.load %arg6[%c3] : memref<11xf32, #tpu.memory_space<smem>>
    %29 = vector.broadcast %28 : f32 to vector<16x128xf32>
    %30 = arith.mulf %29, %27 : vector<16x128xf32>
    %31 = arith.addf %26, %30 : vector<16x128xf32>
    %cst_17 = arith.constant dense<0.000000e+00> : vector<16x128xf32>
    %32 = tpu.matmul %27, %13, %cst_17 {dimension_numbers = #tpu.dot_dimension_numbers<[1], [0], [0], [1], [0, 0, 1, 1], [], []>} : vector<16x128xf32>, vector<128x128xf32>, vector<16x128xf32> -> vector<16x128xf32>
    %c4 = arith.constant 4 : index
    %33 = memref.load %arg6[%c4] : memref<11xf32, #tpu.memory_space<smem>>
    %34 = vector.broadcast %33 : f32 to vector<16x128xf32>
    %35 = arith.mulf %34, %32 : vector<16x128xf32>
    %36 = arith.addf %31, %35 : vector<16x128xf32>
    %cst_18 = arith.constant dense<0.000000e+00> : vector<16x128xf32>
    %37 = tpu.matmul %32, %13, %cst_18 {dimension_numbers = #tpu.dot_dimension_numbers<[1], [0], [0], [1], [0, 0, 1, 1], [], []>} : vector<16x128xf32>, vector<128x128xf32>, vector<16x128xf32> -> vector<16x128xf32>
    %c5 = arith.constant 5 : index
    %38 = memref.load %arg6[%c5] : memref<11xf32, #tpu.memory_space<smem>>
    %39 = vector.broadcast %38 : f32 to vector<16x128xf32>
    %40 = arith.mulf %39, %37 : vector<16x128xf32>
    %41 = arith.addf %36, %40 : vector<16x128xf32>
    %cst_19 = arith.constant dense<0.000000e+00> : vector<16x128xf32>
    %42 = tpu.matmul %37, %13, %cst_19 {dimension_numbers = #tpu.dot_dimension_numbers<[1], [0], [0], [1], [0, 0, 1, 1], [], []>} : vector<16x128xf32>, vector<128x128xf32>, vector<16x128xf32> -> vector<16x128xf32>
    %c6 = arith.constant 6 : index
    %43 = memref.load %arg6[%c6] : memref<11xf32, #tpu.memory_space<smem>>
    %44 = vector.broadcast %43 : f32 to vector<16x128xf32>
    %45 = arith.mulf %44, %42 : vector<16x128xf32>
    %46 = arith.addf %41, %45 : vector<16x128xf32>
    %cst_20 = arith.constant dense<0.000000e+00> : vector<16x128xf32>
    %47 = tpu.matmul %42, %13, %cst_20 {dimension_numbers = #tpu.dot_dimension_numbers<[1], [0], [0], [1], [0, 0, 1, 1], [], []>} : vector<16x128xf32>, vector<128x128xf32>, vector<16x128xf32> -> vector<16x128xf32>
    %c7 = arith.constant 7 : index
    %48 = memref.load %arg6[%c7] : memref<11xf32, #tpu.memory_space<smem>>
    %49 = vector.broadcast %48 : f32 to vector<16x128xf32>
    %50 = arith.mulf %49, %47 : vector<16x128xf32>
    %51 = arith.addf %46, %50 : vector<16x128xf32>
    %cst_21 = arith.constant dense<0.000000e+00> : vector<16x128xf32>
    %52 = tpu.matmul %47, %13, %cst_21 {dimension_numbers = #tpu.dot_dimension_numbers<[1], [0], [0], [1], [0, 0, 1, 1], [], []>} : vector<16x128xf32>, vector<128x128xf32>, vector<16x128xf32> -> vector<16x128xf32>
    %c8 = arith.constant 8 : index
    %53 = memref.load %arg6[%c8] : memref<11xf32, #tpu.memory_space<smem>>
    %54 = vector.broadcast %53 : f32 to vector<16x128xf32>
    %55 = arith.mulf %54, %52 : vector<16x128xf32>
    %56 = arith.addf %51, %55 : vector<16x128xf32>
    %cst_22 = arith.constant dense<0.000000e+00> : vector<16x128xf32>
    %57 = tpu.matmul %52, %13, %cst_22 {dimension_numbers = #tpu.dot_dimension_numbers<[1], [0], [0], [1], [0, 0, 1, 1], [], []>} : vector<16x128xf32>, vector<128x128xf32>, vector<16x128xf32> -> vector<16x128xf32>
    %c9 = arith.constant 9 : index
    %58 = memref.load %arg6[%c9] : memref<11xf32, #tpu.memory_space<smem>>
    %59 = vector.broadcast %58 : f32 to vector<16x128xf32>
    %60 = arith.mulf %59, %57 : vector<16x128xf32>
    %61 = arith.addf %56, %60 : vector<16x128xf32>
    %cst_23 = arith.constant dense<0.000000e+00> : vector<16x128xf32>
    %62 = tpu.matmul %57, %13, %cst_23 {dimension_numbers = #tpu.dot_dimension_numbers<[1], [0], [0], [1], [0, 0, 1, 1], [], []>} : vector<16x128xf32>, vector<128x128xf32>, vector<16x128xf32> -> vector<16x128xf32>
    %c10 = arith.constant 10 : index
    %63 = memref.load %arg6[%c10] : memref<11xf32, #tpu.memory_space<smem>>
    %64 = vector.broadcast %63 : f32 to vector<16x128xf32>
    %65 = arith.mulf %64, %62 : vector<16x128xf32>
    %66 = arith.addf %61, %65 : vector<16x128xf32>
    %c0_24 = arith.constant 0 : index
    %c0_25 = arith.constant 0 : index
    %67 = vector.load %arg7[%c0_24, %c0_25] : memref<16x128xf32, #tpu.memory_space<vmem>>, vector<16x128xf32>
    tpu.vector_store %arg7[%c0_24, %c0_25], %66 {strides = array<i32>} : memref<16x128xf32, #tpu.memory_space<vmem>>, vector<16x128xf32>,
    return
  }
}

</mosaic_0001>

<bundles_post_ra>
// kernel: tpu_custom_call.1
= control target key start
LH: loop header
LB: loop body
LE: loop exit
PB: predicated region body
PF: predicated region fallthrough
CT: control target
= control target key end

     0   :  { %12 = vsyncpa [#allocation4], 0  ;;  %s1020_s0 = inlined_call_operand.vmem [shape: f32[32,128], index: 0, kind: input, shape index: {}]   ;;  %s1021_s1 = inlined_call_operand.vmem [shape: f32[64,32], index: 1, kind: input, shape index: {}]   ;;  %s1022_s2 = inlined_call_operand.vmem [shape: f32[64,1], index: 2, kind: input, shape index: {}]   ;;  %s1023_s3 = inlined_call_operand.vmem [shape: f32[16,64], index: 3, kind: input, shape index: {}]   ;;  %s1024_s4 = inlined_call_operand.vmem [shape: f32[16,1], index: 4, kind: input, shape index: {}]   ;;  %s1025_s5 = inlined_call_operand.vmem [shape: f32[128,128], index: 5, kind: input, shape index: {}]   ;;  %s1026_s6 = inlined_call_operand.vmem [shape: f32[11], index: 6, kind: input, shape index: {}]   ;;  %s1027_s7 = inlined_call_operand.hbm [shape: f32[16,128], index: 7, kind: output, shape index: {}]  }
   0x1   :  { %13 = vsyncpa [#allocation3], 0  ;;  %s31_s26 = sshll.u32 %s1026_s6, 4  ;;  %s617_s27 = smov [#allocation2]   ;;  %s32_s26 = int_to_ptr.vmem [resolvable:$true] %s31_s26 }
   0x2   :  { %34 = dma.vmem_to_smem %s32_s26, 16, %s617_s27, [#allocation4]  }
   0x3   :  { %613 = dma.done.wait [#allocation4], 16  }
   0x4   :  { %614 = vsyncadd [#allocation4], 4294967280 }
   0x5   :  { %39 = sfence }
   0x6   :  { %v51_v0 = vld [vmem:[%s1020_s0 + $0x18] sm:$0xff]  ;;  %v57_v1 = vld [vmem:[%s1022_s2 + $0x28] sm:$0xff]  ;;  %v50_v2 = vld [vmem:[%s1020_s0 + $0x10] sm:$0xff]  ;;  %v618_v3 = vmov 0   ;;  %vm100_vm0 = vcmask 261120   ;;  %vm188_vm1 = vcmask 523264  }
   0x7   :  { %137 = vmatpush.msra.mxu0 %v51_v0  ;;  %575 = vset.pattern.permute.xlu1 %v618_v3  ;;  %v49_v4 = vld [vmem:[%s1020_s0 + $0x8] sm:$0xff]  ;;  %v59_v5 = vld [vmem:[%s1022_s2 + $0x38] sm:$0xff]  ;;  %v48_v6 = vld [vmem:[%s1020_s0] sm:$0xff]  ;;  %s979_s26 = sld [smem:[#allocation2 + $0x1]]  ;;  %s619_s12 = smov [#allocation5]  }
   0x8   :  { %87 = vperm.xlu1 %575, %v57_v1   ;;  %574 = vset.pattern.permute.xlu0 %v618_v3  ;;  %v40_v7 = vld [vmem:[%s1021_s1] sm:$0xff]  ;;  %v58_v9 = vld [vmem:[%s1022_s2 + $0x30] sm:$0xff]  ;;  %v41_v10 = vld [vmem:[%s1021_s1 + $0x8] sm:$0xff]  ;;  %s1003_s27 = sld [smem:[#allocation2 + $0x2]]  ;;  %s534_s13 = sshll.u32 %s619_s12, 4  ;;  %s535_s13 = int_to_ptr.vmem [resolvable:$true] %s534_s13 }
   0x9   :  { %138 = vmatpush.msra.mxu0 %v50_v2  ;;  %97 = vperm.xlu0 %574, %v59_v5   ;;  %v56_v8 = vld [vmem:[%s1022_s2 + $0x20] sm:$0xff]  ;;  %v53_v12 = vld [vmem:[%s1022_s2 + $0x8] sm:$0xff]  ;;  %v55_v13 = vld [vmem:[%s1022_s2 + $0x18] sm:$0xff]  ;;  %s1006_s28 = sld [smem:[#allocation2 + $0x3]]  ;;  %s536_s16 = sshll.u32 %s1027_s7, 4  ;;  %s537_s16 = int_to_ptr.hbm [resolvable:$true] %s536_s16 }
   0xa   :  { %576 = vset.pattern.permute.xlu2 %v618_v3  ;;  %v52_v11 = vld [vmem:[%s1022_s2] sm:$0xff]  ;;  %v42_v14 = vld [vmem:[%s1021_s1 + $0x10] sm:$0xff]  ;;  %v43_v16 = vld [vmem:[%s1021_s1 + $0x18] sm:$0xff]  ;;  %s1009_s29 = sld [smem:[#allocation2 + $0x4]]  ;;  %s621_s17 = smov 8  }
   0xb   :  { %139 = vmatpush.msra.mxu0 %v49_v4  ;;  %77 = vperm.xlu2 %576, %v55_v13   ;;  %v54_v15 = vld [vmem:[%s1022_s2 + $0x10] sm:$0xff]  ;;  %v177_v17 = vld [vmem:[%s1024_s4 + $0x8] sm:$0xff]  ;;  %v176_v18 = vld [vmem:[%s1024_s4] sm:$0xff]  ;;  %s563_s30 = sld [smem:[#allocation2 + $0x5]]  ;;  %s620_s2 = smov 128  }
   0xc   :  { %v44_v19 = vld [vmem:[%s1021_s1 + $0x20] sm:$0xff]  ;;  %v45_v20 = vld [vmem:[%s1021_s1 + $0x28] sm:$0xff]  ;;  %v46_v21 = vld [vmem:[%s1021_s1 + $0x30] sm:$0xff]  ;;  %s564_s8 = sld [smem:[#allocation2 + $0x6]] }
   0xd   :  { %140 = vmatpush.msra.mxu0 %v48_v6  ;;  %v47_v22 = vld [vmem:[%s1021_s1 + $0x38] sm:$0xff]  ;;  %v749_v34 = vld [vmem:[%s1025_s5 + $0x70] sm:$0xff]  ;;  %v756_v36 = vld [vmem:[%s1025_s5 + $0x68] sm:$0xff]  ;;  %s565_s9 = sld [smem:[#allocation2 + $0x7]] }
   0xe   :  { %549 = vmatmul.msk.f32.vlgmr.msra.gmra.mxu0 %vm100_vm0, %v40_v7  ;;  %v744_v33 = vld [vmem:[%s1025_s5 + $0x78] sm:$0xff]  ;;  %v764_v39 = vld [vmem:[%s1025_s5 + $0x60] sm:$0xff]  ;;  %v780_v45 = vld [vmem:[%s1025_s5 + $0x50] sm:$0xff]  ;;  %s566_s10 = sld [smem:[#allocation2 + $0x8]] }
   0xf   :  { %238 = vmatpush.msra.mxu2 %v744_v33  ;;  %267 = vmatpush.msra.mxu3 %v744_v33  ;;  %v772_v42 = vld [vmem:[%s1025_s5 + $0x58] sm:$0xff]  ;;  %v787_v49 = vld [vmem:[%s1025_s5 + $0x48] sm:$0xff]  ;;  %v795_v53 = vld [vmem:[%s1025_s5 + $0x40] sm:$0xff]  ;;  %s567_s6 = sld [smem:[#allocation2 + $0x9]] }
  0x10   :  { %82 = vperm.xlu1 %575, %v56_v8   ;;  %383 = vmatpush.msrb.mxu0 %v744_v33  ;;  %v803_v57 = vld [vmem:[%s1025_s5 + $0x38] sm:$0xff]  ;;  %v811_v60 = vld [vmem:[%s1025_s5 + $0x30] sm:$0xff]  ;;  %v820_v63 = vld [vmem:[%s1025_s5 + $0x28] sm:$0xff]  ;;  %s568_s11 = sld [smem:[#allocation2 + $0xa]] }
  0x11   :  { %92 = vperm.xlu0 %574, %v58_v9   ;;  %239 = vmatpush.msra.mxu2 %v749_v34  ;;  %v828_v1 = vld [vmem:[%s1025_s5 + $0x20] sm:$0xff]  ;;  %v839_v4 = vld [vmem:[%s1025_s5 + $0x18] sm:$0xff]  ;;  %v848_v5 = vld [vmem:[%s1025_s5 + $0x10] sm:$0xff] }
  0x12   :  { %268 = vmatpush.msra.mxu3 %v749_v34  ;;  %384 = vmatpush.msrb.mxu0 %v749_v34  ;;  %v174_v3 = vld [vmem:[%s1023_s3] sm:$0xff]  ;;  %v175_v6 = vld [vmem:[%s1023_s3 + $0x8] sm:$0xff] }
  0x13   :  { %72 = vperm.xlu2 %576, %v54_v15   ;;  %240 = vmatpush.msra.mxu2 %v756_v36  ;;  %v879_v7 = vld [vmem:[%s1025_s5 + $0x8] sm:$0xff]  ;;  %v886_v8 = vld [vmem:[%s1025_s5] sm:$0xff]  ;;  %s977_s5 = sld [smem:[#allocation2]] }
  0x14   :  { %269 = vmatpush.msra.mxu3 %v756_v36  ;;  %385 = vmatpush.msrb.mxu0 %v756_v36 }
  0x15   :  { %241 = vmatpush.msra.mxu2 %v764_v39 }
  0x16   :  { %550 = vmatmul.msk.f32.gmra.mxu0 %vm100_vm0, %v41_v10  ;;  %270 = vmatpush.msra.mxu3 %v764_v39 }
  0x17   :  { %386 = vmatpush.msrb.mxu0 %v764_v39  ;;  %242 = vmatpush.msra.mxu2 %v772_v42 }
  0x18   :  { %62 = vperm.xlu1 %575, %v52_v11   ;;  %271 = vmatpush.msra.mxu3 %v772_v42 }
  0x19   :  { %67 = vperm.xlu0 %574, %v53_v12   ;;  %387 = vmatpush.msrb.mxu0 %v772_v42  ;;  %v235_v15 = vstv %s977_s5 }
  0x1a   :  { %243 = vmatpush.msra.mxu2 %v780_v45  ;;  %272 = vmatpush.msra.mxu3 %v780_v45 }
  0x1b   :  { %180 = vperm.xlu2 %576, %v176_v18   ;;  %388 = vmatpush.msrb.mxu0 %v780_v45 }
  0x1c   :  { %244 = vmatpush.msra.mxu2 %v787_v49  ;;  %273 = vmatpush.msra.mxu3 %v787_v49 }
  0x1d   :  { %389 = vmatpush.msrb.mxu0 %v787_v49 }
  0x1e   :  { %551 = vmatmul.msk.f32.gmra.mxu0 %vm100_vm0, %v42_v14  ;;  %245 = vmatpush.msra.mxu2 %v795_v53 }
  0x1f   :  { %274 = vmatpush.msra.mxu3 %v795_v53  ;;  %390 = vmatpush.msrb.mxu0 %v795_v53 }
  0x20   :  { %246 = vmatpush.msra.mxu2 %v803_v57 }
  0x21   :  { %185 = vperm.xlu0 %574, %v177_v17   ;;  %275 = vmatpush.msra.mxu3 %v803_v57 }
  0x22   :  { %391 = vmatpush.msrb.mxu0 %v803_v57  ;;  %247 = vmatpush.msra.mxu2 %v811_v60 }
  0x23   :  { %276 = vmatpush.msra.mxu3 %v811_v60 }
  0x24   :  { %392 = vmatpush.msrb.mxu0 %v811_v60  ;;  %248 = vmatpush.msra.mxu2 %v820_v63 }
  0x25   :  { %277 = vmatpush.msra.mxu3 %v820_v63 }
  0x26   :  { %552 = vmatmul.msk.f32.gmra.mxu0 %vm100_vm0, %v43_v16  ;;  %249 = vmatpush.msra.mxu2 %v828_v1  ;;  %v262_v16 = vstv %s979_s26 }
  0x27   :  { %393 = vmatpush.msrb.mxu0 %v820_v63  ;;  %278 = vmatpush.msra.mxu3 %v828_v1 }
  0x28   :  { %250 = vmatpush.msra.mxu2 %v839_v4 }
  0x29   :  { %279 = vmatpush.msra.mxu3 %v839_v4  ;;  %394 = vmatpush.msrb.mxu0 %v828_v1 }
  0x2a   :  { %251 = vmatpush.msra.mxu2 %v848_v5 }
  0x2b   :  { %280 = vmatpush.msra.mxu3 %v848_v5  ;;  %395 = vmatpush.msrb.mxu0 %v839_v4 }
  0x2c   :  { %252 = vmatpush.msra.mxu2 %v879_v7 }
  0x2d   :  { %396 = vmatpush.msrb.mxu0 %v848_v5  ;;  %281 = vmatpush.msra.mxu3 %v879_v7 }
  0x2e   :  { %553 = vmatmul.msk.f32.gmra.mxu0 %vm100_vm0, %v44_v19  ;;  %253 = vmatpush.msra.mxu2 %v886_v8 }
  0x2f   :  { %397 = vmatpush.msrb.mxu0 %v879_v7  ;;  %282 = vmatpush.msra.mxu3 %v886_v8 }
  0x30   :  { %325 = vmatpush.msrb.mxu2 %v744_v33 }
  0x31   :  { %354 = vmatpush.msrb.mxu3 %v744_v33  ;;  %398 = vmatpush.msrb.mxu0 %v886_v8 }
  0x32   :  { %326 = vmatpush.msrb.mxu2 %v749_v34 }
  0x33   :  { %355 = vmatpush.msrb.mxu3 %v749_v34  ;;  %499 = vmatpush.msra.mxu0 %v744_v33 }
  0x34   :  { %327 = vmatpush.msrb.mxu2 %v756_v36 }
  0x35   :  { %356 = vmatpush.msrb.mxu3 %v756_v36  ;;  %500 = vmatpush.msra.mxu0 %v749_v34 }
  0x36   :  { %554 = vmatmul.msk.f32.gmra.mxu0 %vm100_vm0, %v45_v20  ;;  %328 = vmatpush.msrb.mxu2 %v764_v39 }
  0x37   :  { %357 = vmatpush.msrb.mxu3 %v764_v39  ;;  %501 = vmatpush.msra.mxu0 %v756_v36 }
  0x38   :  { %329 = vmatpush.msrb.mxu2 %v772_v42 }
  0x39   :  { %358 = vmatpush.msrb.mxu3 %v772_v42  ;;  %502 = vmatpush.msra.mxu0 %v764_v39 }
  0x3a   :  { %330 = vmatpush.msrb.mxu2 %v780_v45 }
  0x3b   :  { %359 = vmatpush.msrb.mxu3 %v780_v45  ;;  %503 = vmatpush.msra.mxu0 %v772_v42 }
  0x3c   :  { %331 = vmatpush.msrb.mxu2 %v787_v49 }
  0x3d   :  { %360 = vmatpush.msrb.mxu3 %v787_v49  ;;  %504 = vmatpush.msra.mxu0 %v780_v45 }
  0x3e   :  { %555 = vmatmul.msk.f32.gmra.mxu0 %vm100_vm0, %v46_v21  ;;  %332 = vmatpush.msrb.mxu2 %v795_v53 }
  0x3f   :  { %361 = vmatpush.msrb.mxu3 %v795_v53  ;;  %505 = vmatpush.msra.mxu0 %v787_v49 }
  0x40   :  { %333 = vmatpush.msrb.mxu2 %v803_v57 }
  0x41   :  { %362 = vmatpush.msrb.mxu3 %v803_v57  ;;  %506 = vmatpush.msra.mxu0 %v795_v53 }
  0x42   :  { %334 = vmatpush.msrb.mxu2 %v811_v60 }
  0x43   :  { %363 = vmatpush.msrb.mxu3 %v811_v60  ;;  %507 = vmatpush.msra.mxu0 %v803_v57 }
  0x44   :  { %335 = vmatpush.msrb.mxu2 %v820_v63 }
  0x45   :  { %364 = vmatpush.msrb.mxu3 %v820_v63  ;;  %508 = vmatpush.msra.mxu0 %v811_v60 }
  0x46   :  { %556 = vmatmul.msk.f32.gmra.mxu0 %vm100_vm0, %v47_v22  ;;  %336 = vmatpush.msrb.mxu2 %v828_v1  ;;  %v291_v22 = vstv %s1003_s27 }
  0x47   :  { %365 = vmatpush.msrb.mxu3 %v828_v1  ;;  %509 = vmatpush.msra.mxu0 %v820_v63 }
  0x48   :  { %337 = vmatpush.msrb.mxu2 %v839_v4 }
  0x49   :  { %366 = vmatpush.msrb.mxu3 %v839_v4  ;;  %510 = vmatpush.msra.mxu0 %v828_v1 }
  0x4a   :  { %338 = vmatpush.msrb.mxu2 %v848_v5 }
  0x4b   :  { %367 = vmatpush.msrb.mxu3 %v848_v5  ;;  %511 = vmatpush.msra.mxu0 %v839_v4 }
  0x4c   :  { %339 = vmatpush.msrb.mxu2 %v879_v7 }
  0x4d   :  { %368 = vmatpush.msrb.mxu3 %v879_v7  ;;  %512 = vmatpush.msra.mxu0 %v848_v5 }
  0x4e   :  { %340 = vmatpush.msrb.mxu2 %v886_v8 }
  0x4f   :  { %369 = vmatpush.msrb.mxu3 %v886_v8  ;;  %513 = vmatpush.msra.mxu0 %v879_v7 }
  0x51   :  { %514 = vmatpush.msra.mxu0 %v886_v8 }
  0x65   :  { %v78_v32 = vpop.permute.xlu2 %77 }
  0x6d   :  { %v73_v48 = vpop.permute.xlu2 %72 }
  0x75   :  { %v181_v9 = vpop.permute.xlu2 %180 }
  0x7a   :  { %v88_v30 = vpop.permute.xlu1 %87 }
  0x7b   :  { %v98_v29 = vpop.permute.xlu0 %97 }
  0x82   :  { %v83_v37 = vpop.permute.xlu1 %82 }
  0x83   :  { %v93_v35 = vpop.permute.xlu0 %92 }
  0x8a   :  { %v63_v56 = vpop.permute.xlu1 %62 }
  0x8b   :  { %v739_v23 = vpop.f32.mrf.mxu0  ;;  %v68_v52 = vpop.permute.xlu0 %67 }
  0x8c   :  { %v143_v61 = vadd.f32 %v739_v23, %v63_v56 }
  0x8e   :  { %v166_v2 = vmax.f32 %v143_v61, 0.0 }
  0x93   :  { %v145_v24 = vpop.f32.mrf.mxu0  ;;  %v186_v12 = vpop.permute.xlu0 %185 }
  0x94   :  { %v146_v58 = vadd.f32 %v145_v24, %v68_v52 }
  0x96   :  { %v167_v0 = vmax.f32 %v146_v58, 0.0 }
  0x9b   :  { %v148_v25 = vpop.f32.mrf.mxu0 }
  0x9c   :  { %v149_v54 = vadd.f32 %v148_v25, %v73_v48 }
  0x9e   :  { %v168_v62 = vmax.f32 %v149_v54, 0.0 }
  0xa3   :  { %v151_v26 = vpop.f32.mrf.mxu0 }
  0xa4   :  { %v152_v50 = vadd.f32 %v151_v26, %v78_v32  ;;  %v349_v32 = vstv %s1009_s29 }
  0xa6   :  { %v169_v59 = vmax.f32 %v152_v50, 0.0  ;;  %v436_v50 = vstv %s565_s9 }
  0xab   :  { %v154_v27 = vpop.f32.mrf.mxu0 }
  0xac   :  { %v155_v46 = vadd.f32 %v154_v27, %v83_v37  ;;  %v320_v27 = vstv %s1006_s28  ;;  %v378_v37 = vstv %s563_s30 }
  0xae   :  { %v170_v55 = vmax.f32 %v155_v46, 0.0 }
  0xb3   :  { %v157_v28 = vpop.f32.mrf.mxu0 }
  0xb4   :  { %v158_v43 = vadd.f32 %v157_v28, %v88_v30 }
  0xb6   :  { %v171_v51 = vmax.f32 %v158_v43, 0.0 }
  0xbb   :  { %v160_v31 = vpop.f32.mrf.mxu0 }
  0xbc   :  { %v161_v40 = vadd.f32 %v160_v31, %v93_v35 }
  0xbe   :  { %v172_v47 = vmax.f32 %v161_v40, 0.0 }
  0xc3   :  { %v163_v38 = vpop.f32.mrf.mxu0 }
  0xc4   :  { %v164_v41 = vadd.f32 %v163_v38, %v98_v29 }
  0xc6   :  { %v173_v44 = vmax.f32 %v164_v41, 0.0 }
  0xc8   :  { %203 = vmatpush.msra.mxu1 %v173_v44 }
  0xca   :  { %204 = vmatpush.msra.mxu1 %v172_v47 }
  0xcc   :  { %205 = vmatpush.msra.mxu1 %v171_v51 }
  0xce   :  { %206 = vmatpush.msra.mxu1 %v170_v55 }
  0xd0   :  { %207 = vmatpush.msra.mxu1 %v169_v59 }
  0xd2   :  { %208 = vmatpush.msra.mxu1 %v168_v62 }
  0xd4   :  { %209 = vmatpush.msra.mxu1 %v167_v0 }
  0xd6   :  { %210 = vmatpush.msra.mxu1 %v166_v2 }
  0xd7   :  { %557 = vmatmul.msk.f32.vlgmr.msra.gmra.mxu1 %vm188_vm1, %v174_v3  ;;  %v465_v3 = vstv %s566_s10 }
  0xd8   :  { %296 = vmatpush.msrb.mxu1 %v744_v33 }
  0xda   :  { %297 = vmatpush.msrb.mxu1 %v749_v34 }
  0xdc   :  { %298 = vmatpush.msrb.mxu1 %v756_v36 }
  0xde   :  { %299 = vmatpush.msrb.mxu1 %v764_v39 }
  0xdf   :  { %558 = vmatmul.msk.f32.gmra.mxu1 %vm188_vm1, %v175_v6 }
  0xe0   :  { %300 = vmatpush.msrb.mxu1 %v772_v42 }
  0xe2   :  { %301 = vmatpush.msrb.mxu1 %v780_v45 }
  0xe4   :  { %302 = vmatpush.msrb.mxu1 %v787_v49 }
  0xe6   :  { %303 = vmatpush.msrb.mxu1 %v795_v53 }
  0xe8   :  { %304 = vmatpush.msrb.mxu1 %v803_v57 }
  0xea   :  { %305 = vmatpush.msrb.mxu1 %v811_v60 }
  0xec   :  { %306 = vmatpush.msrb.mxu1 %v820_v63 }
  0xee   :  { %307 = vmatpush.msrb.mxu1 %v828_v1 }
  0xf0   :  { %308 = vmatpush.msrb.mxu1 %v839_v4 }
  0xf2   :  { %309 = vmatpush.msrb.mxu1 %v848_v5 }
  0xf4   :  { %310 = vmatpush.msrb.mxu1 %v879_v7 }
  0xf6   :  { %311 = vmatpush.msrb.mxu1 %v886_v8 }
  0xf8   :  { %412 = vmatpush.msra.mxu1 %v744_v33 }
  0xfa   :  { %413 = vmatpush.msra.mxu1 %v749_v34 }
  0xfc   :  { %414 = vmatpush.msra.mxu1 %v756_v36 }
  0xfe   :  { %415 = vmatpush.msra.mxu1 %v764_v39 }
 0x100   :  { %416 = vmatpush.msra.mxu1 %v772_v42 }
 0x102   :  { %417 = vmatpush.msra.mxu1 %v780_v45 }
 0x104   :  { %418 = vmatpush.msra.mxu1 %v787_v49 }
 0x106   :  { %419 = vmatpush.msra.mxu1 %v795_v53 }
 0x108   :  { %420 = vmatpush.msra.mxu1 %v803_v57 }
 0x10a   :  { %421 = vmatpush.msra.mxu1 %v811_v60 }
 0x10c   :  { %422 = vmatpush.msra.mxu1 %v820_v63 }
 0x10e   :  { %423 = vmatpush.msra.mxu1 %v828_v1 }
 0x110   :  { %424 = vmatpush.msra.mxu1 %v839_v4 }
 0x112   :  { %425 = vmatpush.msra.mxu1 %v848_v5 }
 0x114   :  { %426 = vmatpush.msra.mxu1 %v879_v7 }
 0x116   :  { %427 = vmatpush.msra.mxu1 %v886_v8 }
 0x154   :  { %v212_v10 = vpop.f32.mrf.mxu1 }
 0x155   :  { %v213_v11 = vadd.f32 %v212_v10, %v181_v9  ;;  %v494_v10 = vstv %s567_s6 }
 0x157   :  { %254 = vmatmul.f32.vlgmr.msra.gmra.mxu2 %v213_v11  ;;  %v236_v18 = vmul.f32 %v235_v15, %v213_v11 }
 0x158   :  { %441 = vmatpush.msra.mxu2 %v744_v33 }
 0x15a   :  { %442 = vmatpush.msra.mxu2 %v749_v34 }
 0x15c   :  { %v215_v13 = vpop.f32.mrf.mxu1  ;;  %443 = vmatpush.msra.mxu2 %v756_v36 }
 0x15d   :  { %v961_v14 = vadd.f32 %v215_v13, %v186_v12 }
 0x15e   :  { %444 = vmatpush.msra.mxu2 %v764_v39 }
 0x15f   :  { %257 = vmatmul.f32.gmra.mxu2 %v961_v14  ;;  %v237_v48 = vmul.f32 %v235_v15, %v961_v14 }
 0x160   :  { %445 = vmatpush.msra.mxu2 %v772_v42 }
 0x162   :  { %446 = vmatpush.msra.mxu2 %v780_v45 }
 0x164   :  { %447 = vmatpush.msra.mxu2 %v787_v49 }
 0x166   :  { %448 = vmatpush.msra.mxu2 %v795_v53 }
 0x168   :  { %449 = vmatpush.msra.mxu2 %v803_v57 }
 0x16a   :  { %450 = vmatpush.msra.mxu2 %v811_v60 }
 0x16c   :  { %451 = vmatpush.msra.mxu2 %v820_v63 }
 0x16e   :  { %452 = vmatpush.msra.mxu2 %v828_v1 }
 0x170   :  { %453 = vmatpush.msra.mxu2 %v839_v4 }
 0x172   :  { %454 = vmatpush.msra.mxu2 %v848_v5 }
 0x174   :  { %455 = vmatpush.msra.mxu2 %v879_v7 }
 0x176   :  { %456 = vmatpush.msra.mxu2 %v886_v8 }
 0x1da   :  { %v255_v17 = vpop.f32.mrf.mxu2 }
 0x1db   :  { %v263_v19 = vmul.f32 %v262_v16, %v255_v17  ;;  %283 = vmatmul.f32.vlgmr.msra.gmra.mxu3 %v255_v17  ;;  %v523_v17 = vstv %s568_s11 }
 0x1dc   :  { %470 = vmatpush.msra.mxu3 %v744_v33 }
 0x1dd   :  { %v265_v20 = vadd.f32 %v263_v19, %v236_v18 }
 0x1de   :  { %471 = vmatpush.msra.mxu3 %v749_v34 }
 0x1e0   :  { %472 = vmatpush.msra.mxu3 %v756_v36 }
 0x1e2   :  { %v258_v21 = vpop.f32.mrf.mxu2  ;;  %473 = vmatpush.msra.mxu3 %v764_v39 }
 0x1e3   :  { %286 = vmatmul.f32.gmra.mxu3 %v258_v21  ;;  %v264_v47 = vmul.f32 %v262_v16, %v258_v21 }
 0x1e4   :  { %474 = vmatpush.msra.mxu3 %v772_v42  ;;  %v407_v42 = vstv %s564_s8 }
 0x1e5   :  { %v266_v51 = vadd.f32 %v264_v47, %v237_v48 }
 0x1e6   :  { %475 = vmatpush.msra.mxu3 %v780_v45 }
 0x1e8   :  { %476 = vmatpush.msra.mxu3 %v787_v49 }
 0x1ea   :  { %477 = vmatpush.msra.mxu3 %v795_v53 }
 0x1ec   :  { %478 = vmatpush.msra.mxu3 %v803_v57 }
 0x1ee   :  { %479 = vmatpush.msra.mxu3 %v811_v60 }
 0x1f0   :  { %480 = vmatpush.msra.mxu3 %v820_v63 }
 0x1f2   :  { %481 = vmatpush.msra.mxu3 %v828_v1 }
 0x1f4   :  { %482 = vmatpush.msra.mxu3 %v839_v4 }
 0x1f6   :  { %483 = vmatpush.msra.mxu3 %v848_v5 }
 0x1f8   :  { %484 = vmatpush.msra.mxu3 %v879_v7 }
 0x1fa   :  { %485 = vmatpush.msra.mxu3 %v886_v8 }
 0x25e   :  { %v284_v23 = vpop.f32.mrf.mxu3 }
 0x25f   :  { %v292_v24 = vmul.f32 %v291_v22, %v284_v23  ;;  %312 = vmatmul.f32.vlgmr.msrb.gmra.mxu1 %v284_v23 }
 0x261   :  { %v294_v25 = vadd.f32 %v292_v24, %v265_v20 }
 0x266   :  { %v287_v26 = vpop.f32.mrf.mxu3 }
 0x267   :  { %315 = vmatmul.f32.gmra.mxu1 %v287_v26  ;;  %v293_v49 = vmul.f32 %v291_v22, %v287_v26 }
 0x269   :  { %v295_v54 = vadd.f32 %v293_v49, %v266_v51 }
 0x2dc   :  { %v313_v28 = vpop.f32.mrf.mxu1 }
 0x2dd   :  { %v321_v29 = vmul.f32 %v320_v27, %v313_v28  ;;  %341 = vmatmul.f32.vlgmr.msrb.gmra.mxu2 %v313_v28 }
 0x2df   :  { %v323_v30 = vadd.f32 %v321_v29, %v294_v25 }
 0x2e4   :  { %v316_v31 = vpop.f32.mrf.mxu1 }
 0x2e5   :  { %344 = vmatmul.f32.gmra.mxu2 %v316_v31  ;;  %v322_v52 = vmul.f32 %v320_v27, %v316_v31 }
 0x2e7   :  { %v324_v57 = vadd.f32 %v322_v52, %v295_v54 }
 0x360   :  { %v342_v33 = vpop.f32.mrf.mxu2 }
 0x361   :  { %v350_v34 = vmul.f32 %v349_v32, %v342_v33  ;;  %370 = vmatmul.f32.vlgmr.msrb.gmra.mxu3 %v342_v33 }
 0x363   :  { %v352_v35 = vadd.f32 %v350_v34, %v323_v30 }
 0x368   :  { %v345_v36 = vpop.f32.mrf.mxu2 }
 0x369   :  { %373 = vmatmul.f32.gmra.mxu3 %v345_v36  ;;  %v351_v55 = vmul.f32 %v349_v32, %v345_v36 }
 0x36b   :  { %v353_v60 = vadd.f32 %v351_v55, %v324_v57 }
 0x3e4   :  { %v371_v38 = vpop.f32.mrf.mxu3 }
 0x3e5   :  { %v379_v39 = vmul.f32 %v378_v37, %v371_v38  ;;  %399 = vmatmul.f32.vlgmr.msrb.gmra.mxu0 %v371_v38 }
 0x3e7   :  { %v381_v40 = vadd.f32 %v379_v39, %v352_v35 }
 0x3ec   :  { %v374_v41 = vpop.f32.mrf.mxu3 }
 0x3ed   :  { %402 = vmatmul.f32.gmra.mxu0 %v374_v41  ;;  %v380_v58 = vmul.f32 %v378_v37, %v374_v41 }
 0x3ef   :  { %v382_v62 = vadd.f32 %v380_v58, %v353_v60 }
 0x462   :  { %v400_v43 = vpop.f32.mrf.mxu0 }
 0x463   :  { %v408_v44 = vmul.f32 %v407_v42, %v400_v43  ;;  %428 = vmatmul.f32.vlgmr.msra.gmra.mxu1 %v400_v43 }
 0x465   :  { %v410_v45 = vadd.f32 %v408_v44, %v381_v40 }
 0x46a   :  { %v403_v46 = vpop.f32.mrf.mxu0 }
 0x46b   :  { %431 = vmatmul.f32.gmra.mxu1 %v403_v46  ;;  %v409_v61 = vmul.f32 %v407_v42, %v403_v46 }
 0x46d   :  { %v411_v0 = vadd.f32 %v409_v61, %v382_v62 }
 0x4e0   :  { %v429_v53 = vpop.f32.mrf.mxu1 }
 0x4e1   :  { %457 = vmatmul.f32.vlgmr.msra.gmra.mxu2 %v429_v53  ;;  %v437_v56 = vmul.f32 %v436_v50, %v429_v53 }
 0x4e3   :  { %v439_v59 = vadd.f32 %v437_v56, %v410_v45 }
 0x4e8   :  { %v432_v63 = vpop.f32.mrf.mxu1 }
 0x4e9   :  { %v438_v1 = vmul.f32 %v436_v50, %v432_v63  ;;  %460 = vmatmul.f32.gmra.mxu2 %v432_v63 }
 0x4eb   :  { %v440_v2 = vadd.f32 %v438_v1, %v411_v0 }
 0x564   :  { %v458_v4 = vpop.f32.mrf.mxu2 }
 0x565   :  { %486 = vmatmul.f32.vlgmr.msra.gmra.mxu3 %v458_v4  ;;  %v466_v5 = vmul.f32 %v465_v3, %v458_v4 }
 0x567   :  { %v468_v6 = vadd.f32 %v466_v5, %v439_v59 }
 0x56c   :  { %v461_v7 = vpop.f32.mrf.mxu2 }
 0x56d   :  { %v467_v8 = vmul.f32 %v465_v3, %v461_v7  ;;  %489 = vmatmul.f32.gmra.mxu3 %v461_v7 }
 0x56f   :  { %v469_v9 = vadd.f32 %v467_v8, %v440_v2 }
 0x5e8   :  { %v487_v11 = vpop.f32.mrf.mxu3 }
 0x5e9   :  { %515 = vmatmul.f32.vlgmr.msra.gmra.mxu0 %v487_v11  ;;  %v495_v12 = vmul.f32 %v494_v10, %v487_v11 }
 0x5eb   :  { %v497_v13 = vadd.f32 %v495_v12, %v468_v6 }
 0x5f0   :  { %v490_v14 = vpop.f32.mrf.mxu3 }
 0x5f1   :  { %v496_v15 = vmul.f32 %v494_v10, %v490_v14  ;;  %518 = vmatmul.f32.gmra.mxu0 %v490_v14 }
 0x5f3   :  { %v498_v16 = vadd.f32 %v496_v15, %v469_v9 }
 0x666   :  { %v516_v18 = vpop.f32.mrf.mxu0 }
 0x667   :  { %v524_v19 = vmul.f32 %v523_v17, %v516_v18 }
 0x669   :  { %v526_v20 = vadd.f32 %v524_v19, %v497_v13 }
 0x66b   :  { %528 = vst [vmem:[#allocation5] sm:$0xff] %v526_v20 }
 0x66e   :  { %v519_v21 = vpop.f32.mrf.mxu0 }
 0x66f   :  { %v525_v22 = vmul.f32 %v523_v17, %v519_v21 }
 0x671   :  { %v527_v23 = vadd.f32 %v525_v22, %v498_v16 }
 0x673   :  { %529 = vst [vmem:[#allocation5 + $0x8] sm:$0xff] %v527_v23 }
 0x674   :  { %542 = dma.vmem_to_hbm [thread:$0]  %s535_s13, 256, %s537_s16, [#allocation3], %s620_s2, %s620_s2, %s621_s17  }
 0x675   :  { %615 = dma.done.wait [#allocation3], 256  }
 0x676   :  { %616 = vsyncadd [#allocation3], 4294967040 }
 0x677   :  { %547 = vsyncpa [#allocation3], 1 }
 0x678   :  { %548 = vsyncpa [#allocation4], 1 }

</bundles_post_ra>
